<compile_context>
chip_gen: v6e
topology: v6e:2x2x1
jax: 0.10.0
libtpu: 0.0.40
codegen_flags: <defaults>
</compile_context>

<pallas_src>
import functools
import numpy as np

import jax
import jax.numpy as jnp
from jax import lax
from jax.experimental import pallas as pl
from jax.experimental.pallas import tpu as pltpu


def _round_up(x, m):
    return ((x + m - 1) // m) * m


def _cdiv(a, b):
    return -(-a // b)


# ----------------------------- kernel body ------------------------------------

def _attn_kernel(*refs, has_label, return_score, n2, inv_topk, mxu_dtype, approx):
    """One [tile_m, :] row tile of the attention forward pass.

    Inputs (VMEM blocks):
      x1   [tile_m, item_pad]   mxu_dtype  (streamed per tile)
      wq   [item_pad, dim_pad]  mxu_dtype  (resident; 1/sqrt(item) folded in)
      bq   [1, dim_pad]         f32        (resident; scale folded in)
      k    [n2_pad, dim_pad]    mxu_dtype  (resident; precomputed K = x2 @ Wk^T + bk)
      x2   [n2_pad, item_pad]   mxu_dtype  (resident)
      lm   [tile_m, n2_pad]     mxu_dtype  (optional label_map, zero padded)
    Outputs:
      out   [tile_m, item_pad]  f32
      score [tile_m, n2_pad]    f32        (optional)
    """
    if has_label:
        x1_ref, wq_ref, bq_ref, k_ref, x2_ref, lm_ref = refs[:6]
        out_refs = refs[6:]
    else:
        x1_ref, wq_ref, bq_ref, k_ref, x2_ref = refs[:5]
        lm_ref = None
        out_refs = refs[5:]
    if return_score:
        out_ref, score_ref = out_refs
    else:
        (out_ref,) = out_refs

    f32 = jnp.float32

    # Q projection on the MXU, f32 accumulation; 1/sqrt(item) already folded in.
    q = jnp.dot(x1_ref[...], wq_ref[...], preferred_element_type=f32) + bq_ref[...]

    # logits = (Q / sqrt(item)) @ K^T  — NT contraction, no transpose materialized.
    logits = lax.dot_general(
        q.astype(mxu_dtype), k_ref[...],
        dimension_numbers=(((1,), (1,)), ((), ())),
        preferred_element_type=f32)                          # [tile_m, n2_pad]

    n2_pad = logits.shape[1]
    if lm_ref is None and n2_pad > n2:
        # Padded K rows are meaningless for the softmax path -> mask them out.
        col = lax.broadcasted_iota(jnp.int32, logits.shape, 1)
        logits = jnp.where(col < n2, logits, -1e30)

    # Row-max subtraction for numerical stability.  For the label path this is
    # an exact rewrite of the reference:
    #   e_raw / (sum(e_raw) + 1e-8) == e / (sum(e) + 1e-8 * exp(-m)).
    m = jnp.max(logits, axis=1, keepdims=True)
    e = jnp.exp(logits - m)
    if lm_ref is None:
        denom = jnp.sum(e, axis=1, keepdims=True)
        row_scale = None
    else:
        lm = lm_ref[...].astype(f32)
        e = e * lm
        denom = jnp.sum(e, axis=1, keepdims=True) + 1e-8 * jnp.exp(-m)
        row_scale = jnp.sum(lm, axis=1, keepdims=True) * inv_topk + 1e-8

    x2 = x2_ref[...]
    if return_score:
        # Exact reciprocal for the *returned* score (approx only when discarded).
        score = e * (1.0 / denom)
        if row_scale is not None:
            score = score * row_scale
        out_ref[...] = jnp.dot(score.astype(mxu_dtype), x2,
                               preferred_element_type=f32)
        score_ref[...] = score
    else:
        # Fold the per-row normalization into the narrow [tile_m, item_pad]
        # output instead of scaling the wide [tile_m, n2_pad] score.
        scale = pl.reciprocal(denom, approx=approx)
        if row_scale is not None:
            scale = scale * row_scale
        out_ref[...] = jnp.dot(e.astype(mxu_dtype), x2,
                               preferred_element_type=f32) * scale


# ----------------------------- wrapper ---------------------------------------

class AttentionPallas:
    """JAX/Pallas port of models/Attention.py::Attention."""

    def __init__(self, item_size, topk, dim_size=1000, key=None,
                 mxu_dtype=jnp.bfloat16, approx_recip=True, max_tile_m=256):
        if key is None:
            key = jax.random.PRNGKey(0)
        self.item_size = int(item_size)
        self.dim_size = int(dim_size)
        self.topk = float(topk)
        self.denominator = float(np.sqrt(item_size))
        self.mxu_dtype = mxu_dtype
        self.approx_recip = bool(approx_recip)
        self.max_tile_m = int(max_tile_m)

        kq_w, kq_b, kk_w, kk_b = jax.random.split(key, 4)
        # xavier_normal_: std = sqrt(2 / (fan_in + fan_out))
        xavier_std = float(np.sqrt(2.0 / (item_size + dim_size)))
        # Reference (PyTorch nn.Linear layout) parameters.
        self.wq = xavier_std * jax.random.normal(kq_w, (dim_size, item_size), jnp.float32)
        self.wk = xavier_std * jax.random.normal(kk_w, (dim_size, item_size), jnp.float32)
        self.bq = 0.001 * jax.random.normal(kq_b, (1, dim_size), jnp.float32)
        self.bk = 0.001 * jax.random.normal(kk_b, (1, dim_size), jnp.float32)

        # Kernel-ready Q-side parameters: transposed to [item, dim], padded to
        # lane-aligned shapes, 1/sqrt(item) folded in, pre-cast to the MXU dtype.
        self.item_pad = _round_up(self.item_size, 128)
        self.dim_pad = _round_up(self.dim_size, 128)
        inv_denom = 1.0 / self.denominator
        self._wq_k = jnp.pad(
            self.wq.T * inv_denom,
            ((0, self.item_pad - self.item_size), (0, self.dim_pad - self.dim_size)),
        ).astype(self.mxu_dtype)
        self._bq_k = jnp.pad(self.bq * inv_denom,
                             ((0, 0), (0, self.dim_pad - self.dim_size)))  # stays f32

    # ---- VMEM sizing helpers -------------------------------------------------

    @staticmethod
    def _vmem_capacity():
        try:
            cap = int(getattr(pltpu.get_tpu_info(), "vmem_capacity_bytes", 0))
        except Exception:
            cap = 0
        return cap if cap > 0 else 64 * 1024 * 1024    # conservative (v7x) fallback

    def _vmem_estimate(self, tile_m, n2_pad, has_label, return_score):
        mb = np.dtype(self.mxu_dtype).itemsize
        f32b = 4
        est = 2 * tile_m * self.item_pad * mb            # x1 (double-buffered)
        est += 2 * tile_m * self.item_pad * f32b         # out (double-buffered)
        if return_score:
            est += 2 * tile_m * n2_pad * f32b            # score
        if has_label:
            est += 2 * tile_m * n2_pad * mb              # label_map
        # Grid-invariant residents (assume the pipeliner may double-buffer them).
        resident = (n2_pad * self.item_pad * mb          # x2
                    + self.item_pad * self.dim_pad * mb  # wq
                    + self.dim_pad * f32b                # bq
                    + n2_pad * self.dim_pad * mb)        # K
        est += 2 * resident
        # In-kernel temporaries: q, logits/e (f32), narrow casts, row vectors.
        est += tile_m * self.dim_pad * f32b
        est += 3 * tile_m * n2_pad * f32b
        est += tile_m * n2_pad * mb
        return est

    def _choose_tile_m(self, n1, n2_pad, has_label, return_score, vmem_cap):
        n1_8 = _round_up(max(n1, 1), 8)
        n_tiles = max(_cdiv(n1_8, self.max_tile_m), 1)
        if n_tiles < 2 and n1_8 > 8:
            n_tiles = 2          # keep both TensorCores busy on v7x megacore
        tile_m = _round_up(_cdiv(n1_8, n_tiles), 8)
        # Shrink the tile until the per-tile VMEM footprint fits the budget.
        budget = int(0.75 * vmem_cap)
        while tile_m > 8 and self._vmem_estimate(
                tile_m, n2_pad, has_label, return_score) > budget:
            tile_m = _round_up(max(tile_m // 2, 8), 8)
        n_tiles = _cdiv(n1_8, tile_m)
        return tile_m, n_tiles

    # ---- forward ---------------------------------------------------------------

    def __call__(self, x1, x2=None, label_map=None, return_score=False):
        f32 = jnp.float32
        x1 = jnp.asarray(x1, f32)
        x2a = x1 if x2 is None else jnp.asarray(x2, f32)
        n1, item = x1.shape
        n2 = x2a.shape[0]
        assert item == self.item_size
        has_label = label_map is not None

        item_pad, dim_pad = self.item_pad, self.dim_pad
        n2_pad = _round_up(n2, 128)

        vmem_cap = self._vmem_capacity()
        tile_m, n_tiles = self._choose_tile_m(n1, n2_pad, has_label,
                                              return_score, vmem_cap)
        n1_pad = tile_m * n_tiles

        # ---- hoisted, grid-invariant work (once per call, full f32 precision) ----
        # K projection (removes 2*n2*item*dim redundant MXU FLOPs per row tile).
        k = jnp.dot(x2a, self.wk.T, precision=lax.Precision.HIGHEST) + self.bk
        k_p = jnp.pad(k, ((0, n2_pad - n2), (0, dim_pad - self.dim_size))
                      ).astype(self.mxu_dtype)
        x2_p = jnp.pad(x2a, ((0, n2_pad - n2), (0, item_pad - item))
                       ).astype(self.mxu_dtype)
        x1_p = jnp.pad(x1, ((0, n1_pad - n1), (0, item_pad - item))
                       ).astype(self.mxu_dtype)
        lm_p = None
        if has_label:
            lm = jnp.asarray(label_map, f32)
            lm_p = jnp.pad(lm, ((0, n1_pad - n1), (0, n2_pad - n2))
                           ).astype(self.mxu_dtype)

        grid = (n_tiles,)
        x1_spec = pl.BlockSpec((tile_m, item_pad), lambda i: (i, 0))
        wq_spec = pl.BlockSpec((item_pad, dim_pad), lambda i: (0, 0))    # resident
        bq_spec = pl.BlockSpec((1, dim_pad), lambda i: (0, 0))           # resident
        k_spec = pl.BlockSpec((n2_pad, dim_pad), lambda i: (0, 0))       # resident
        x2_spec = pl.BlockSpec((n2_pad, item_pad), lambda i: (0, 0))     # resident
        lm_spec = pl.BlockSpec((tile_m, n2_pad), lambda i: (i, 0))
        out_spec = pl.BlockSpec((tile_m, item_pad), lambda i: (i, 0))
        score_spec = pl.BlockSpec((tile_m, n2_pad), lambda i: (i, 0))

        out_struct = jax.ShapeDtypeStruct((n1_pad, item_pad), f32)
        score_struct = jax.ShapeDtypeStruct((n1_pad, n2_pad), f32)

        est = self._vmem_estimate(tile_m, n2_pad, has_label, return_score)
        vmem_limit = int(min(max(2 * est, 32 * 1024 * 1024), int(0.9 * vmem_cap)))

        mb = np.dtype(self.mxu_dtype).itemsize
        flops = (2 * n1_pad * item_pad * dim_pad            # Q projection
                 + 2 * n1_pad * n2_pad * dim_pad            # Q @ K^T
                 + 2 * n1_pad * n2_pad * item_pad)          # score @ x2
        bytes_accessed = (mb * (n1_pad * item_pad + n2_pad * item_pad
                                + item_pad * dim_pad + n2_pad * dim_pad)
                          + 4 * dim_pad + 4 * n1_pad * item_pad
                          + (4 * n1_pad * n2_pad if return_score else 0)
                          + (mb * n1_pad * n2_pad if has_label else 0))
        cost = pl.CostEstimate(flops=int(flops), transcendentals=int(n1_pad * n2_pad),
                               bytes_accessed=int(bytes_accessed))
        cparams = pltpu.CompilerParams(dimension_semantics=("parallel",),
                                       vmem_limit_bytes=vmem_limit)

        kernel = functools.partial(
            _attn_kernel, has_label=has_label, return_score=bool(return_score),
            n2=n2, inv_topk=1.0 / self.topk, mxu_dtype=self.mxu_dtype,
            approx=self.approx_recip)

        in_specs = [x1_spec, wq_spec, bq_spec, k_spec, x2_spec]
        args = [x1_p, self._wq_k, self._bq_k, k_p, x2_p]
        if has_label:
            in_specs.append(lm_spec)
            args.append(lm_p)

        if return_score:
            out, score = pl.pallas_call(
                kernel, out_shape=(out_struct, score_struct), grid=grid,
                in_specs=in_specs, out_specs=(out_spec, score_spec),
                compiler_params=cparams, cost_estimate=cost)(*args)
            return out[:n1, :item], score[:n1, :n2]

        out = pl.pallas_call(
            kernel, out_shape=out_struct, grid=grid,
            in_specs=in_specs, out_specs=out_spec,
            compiler_params=cparams, cost_estimate=cost)(*args)
        return out[:n1, :item]


# ----------------------------- reference (plain JAX, f32) ---------------------

def _reference(mod, x1, x2=None, label_map=None):
    if x2 is None:
        x2 = x1
    hi = lax.Precision.HIGHEST
    q = jnp.dot(x1, mod.wq.T, precision=hi) + mod.bq
    k = jnp.dot(x2, mod.wk.T, precision=hi) + mod.bk
    logits = jnp.dot(q, k.T, precision=hi) / mod.denominator
    if label_map is None:
        score = jax.nn.softmax(logits, axis=1)
    else:
        e = jnp.exp(logits) * label_map
        inter = jnp.sum(label_map, axis=1, keepdims=True)
        score = e / (jnp.sum(e, axis=1, keepdims=True) + 1e-08)
        score = score * (inter / mod.topk + 1e-08)
    return jnp.dot(score, x2, precision=hi), score


# ----------------------------- main -------------------------------------------

if __name__ == "__main__":
    key = jax.random.PRNGKey(0)
    k_x1, k_x1b, k_x2b, k_lm, k_params = jax.random.split(key, 5)

    N, ITEM, DIM, TOPK = 16, 32, 64, 5
    x1 = jax.random.normal(k_x1, (N, ITEM), jnp.float32)
    label_map = (jax.random.uniform(k_lm, (N, N)) > 0.5).astype(jnp.float32)
    x1b = jax.random.normal(k_x1b, (20, ITEM), jnp.float32)   # n1 not a multiple of 8
    x2b = jax.random.normal(k_x2b, (24, ITEM), jnp.float32)   # cross attention, n2 != n1

    def check(got, want, rtol=1e-1, atol=2e-2):
        np.testing.assert_allclose(np.asarray(got), np.asarray(want),
                                   rtol=rtol, atol=atol)

    # --- fast path: bf16 MXU operands (approx recip only on no-score paths) ---
    attn = AttentionPallas(item_size=ITEM, topk=TOPK, dim_size=DIM, key=k_params)

    out, score = attn(x1, return_score=True)
    jax.block_until_ready((out, score))
    out_r, score_r = _reference(attn, x1)
    check(out, out_r)
    check(score, score_r)

    out_only = attn(x1)                                  # folded-normalization path
    jax.block_until_ready(out_only)
    check(out_only, out_r)

    out_lm, score_lm = attn(x1, label_map=label_map, return_score=True)
    jax.block_until_ready((out_lm, score_lm))
    out_lm_r, score_lm_r = _reference(attn, x1, label_map=label_map)
    check(out_lm, out_lm_r)
    check(score_lm, score_lm_r)

    out_lm_only = attn(x1, label_map=label_map)
    jax.block_until_ready(out_lm_only)
    check(out_lm_only, out_lm_r)

    out_x, score_x = attn(x1b, x2=x2b, return_score=True)  # padding + cross attention
    jax.block_until_ready((out_x, score_x))
    out_x_r, score_x_r = _reference(attn, x1b, x2=x2b)
    check(out_x, out_x_r)
    check(score_x, score_x_r)

    # --- f32 MXU operands + exact reciprocal everywhere ---
    attn_f32 = AttentionPallas(item_size=ITEM, topk=TOPK, dim_size=DIM, key=k_params,
                               mxu_dtype=jnp.float32, approx_recip=False)
    out_e, score_e = attn_f32(x1, return_score=True)
    jax.block_until_ready((out_e, score_e))
    out_er, score_er = _reference(attn_f32, x1)
    check(out_e, out_er)
    check(score_e, score_er)

    print("KERNEL_OK")
</pallas_src>

<mosaic_0001>
module attributes {stable_mosaic.version = 11 : i64} {
  func.func @_attn_kernel(%arg0: i32, %arg1: memref<8x128xbf16, #tpu.memory_space<vmem>>, %arg2: memref<128x128xbf16, #tpu.memory_space<vmem>>, %arg3: memref<1x128xf32, #tpu.memory_space<vmem>>, %arg4: memref<128x128xbf16, #tpu.memory_space<vmem>>, %arg5: memref<128x128xbf16, #tpu.memory_space<vmem>>, %arg6: memref<8x128xf32, #tpu.memory_space<vmem>>, %arg7: memref<8x128xf32, #tpu.memory_space<vmem>>) attributes {dimension_semantics = [#tpu.dimension_semantics<parallel>], iteration_bounds = array<i64: 2>, scalar_prefetch = 0 : i64, scratch_operands = 0 : i64, tpu.core_type = #tpu.core_type<tc>, window_params = [{transform_indices = @transform_0, window_bounds = array<i64: 8, 128>}, {pipeline_mode = #tpu.pipeline_mode<synchronous>, transform_indices = @transform_1, window_bounds = array<i64: 128, 128>}, {pipeline_mode = #tpu.pipeline_mode<synchronous>, transform_indices = @transform_2, window_bounds = array<i64: 1, 128>}, {pipeline_mode = #tpu.pipeline_mode<synchronous>, transform_indices = @transform_3, window_bounds = array<i64: 128, 128>}, {pipeline_mode = #tpu.pipeline_mode<synchronous>, transform_indices = @transform_4, window_bounds = array<i64: 128, 128>}, {transform_indices = @transform_5, window_bounds = array<i64: 8, 128>}, {transform_indices = @transform_6, window_bounds = array<i64: 8, 128>}]} {
    %c0 = arith.constant 0 : index
    %c0_0 = arith.constant 0 : index
    %0 = vector.load %arg1[%c0, %c0_0] : memref<8x128xbf16, #tpu.memory_space<vmem>>, vector<8x128xbf16>
    %c0_1 = arith.constant 0 : index
    %c0_2 = arith.constant 0 : index
    %1 = vector.load %arg2[%c0_1, %c0_2] : memref<128x128xbf16, #tpu.memory_space<vmem>>, vector<128x128xbf16>
    %cst = arith.constant dense<0.000000e+00> : vector<8x128xf32>
    %2 = tpu.matmul %0, %1, %cst {dimension_numbers = #tpu.dot_dimension_numbers<[1], [0], [0], [1], [0, 0, 1, 1], [], []>} : vector<8x128xbf16>, vector<128x128xbf16>, vector<8x128xf32> -> vector<8x128xf32>
    %c0_3 = arith.constant 0 : index
    %c0_4 = arith.constant 0 : index
    %3 = vector.load %arg3[%c0_3, %c0_4] : memref<1x128xf32, #tpu.memory_space<vmem>>, vector<1x128xf32>
    %4 = vector.broadcast %3 : vector<1x128xf32> to vector<8x128xf32>
    %5 = arith.addf %2, %4 : vector<8x128xf32>
    %6 = arith.truncf %5 : vector<8x128xf32> to vector<8x128xbf16>
    %c0_5 = arith.constant 0 : index
    %c0_6 = arith.constant 0 : index
    %7 = vector.load %arg4[%c0_5, %c0_6] : memref<128x128xbf16, #tpu.memory_space<vmem>>, vector<128x128xbf16>
    %cst_7 = arith.constant dense<0.000000e+00> : vector<8x128xf32>
    %8 = tpu.matmul %6, %7, %cst_7 {dimension_numbers = #tpu.dot_dimension_numbers<[1], [1], [0], [0], [0, 0, 1, 0], [], []>} : vector<8x128xbf16>, vector<128x128xbf16>, vector<8x128xf32> -> vector<8x128xf32>
    %9 = tpu.iota {dimensions = array<i32: 1>} : vector<8x128xi32>
    %c16_i32 = arith.constant 16 : i32
    %10 = vector.broadcast %c16_i32 : i32 to vector<8x128xi32>
    %11 = arith.cmpi slt, %9, %10 : vector<8x128xi32>
    %cst_8 = arith.constant -1.000000e+30 : f32
    %12 = vector.broadcast %cst_8 : f32 to vector<8x128xf32>
    %13 = arith.select %11, %8, %12 : vector<8x128xi1>, vector<8x128xf32>
    %cst_9 = arith.constant dense<0xFF800000> : vector<8xf32>
    %14 = vector.multi_reduction <maximumf>, %13, %cst_9 [1] : vector<8x128xf32> to vector<8xf32>
    %15 = vector.shape_cast %14 : vector<8xf32> to vector<8x1xf32>
    %16 = vector.broadcast %15 : vector<8x1xf32> to vector<8x128xf32>
    %17 = arith.subf %13, %16 : vector<8x128xf32>
    %18 = math.exp %17 : vector<8x128xf32>
    %cst_10 = arith.constant dense<0.000000e+00> : vector<8xf32>
    %19 = vector.multi_reduction <add>, %18, %cst_10 [1] : vector<8x128xf32> to vector<8xf32>
    %20 = vector.shape_cast %19 : vector<8xf32> to vector<8x1xf32>
    %c0_11 = arith.constant 0 : index
    %c0_12 = arith.constant 0 : index
    %21 = vector.load %arg5[%c0_11, %c0_12] : memref<128x128xbf16, #tpu.memory_space<vmem>>, vector<128x128xbf16>
    %cst_13 = arith.constant 1.000000e+00 : f32
    %22 = vector.broadcast %cst_13 : f32 to vector<8x1xf32>
    %23 = arith.divf %22, %20 : vector<8x1xf32>
    %24 = vector.broadcast %23 : vector<8x1xf32> to vector<8x128xf32>
    %25 = arith.mulf %18, %24 : vector<8x128xf32>
    %26 = arith.truncf %25 : vector<8x128xf32> to vector<8x128xbf16>
    %cst_14 = arith.constant dense<0.000000e+00> : vector<8x128xf32>
    %27 = tpu.matmul %26, %21, %cst_14 {dimension_numbers = #tpu.dot_dimension_numbers<[1], [0], [0], [1], [0, 0, 1, 1], [], []>} : vector<8x128xbf16>, vector<128x128xbf16>, vector<8x128xf32> -> vector<8x128xf32>
    %c0_15 = arith.constant 0 : index
    %c0_16 = arith.constant 0 : index
    %28 = vector.load %arg6[%c0_15, %c0_16] : memref<8x128xf32, #tpu.memory_space<vmem>>, vector<8x128xf32>
    tpu.vector_store %arg6[%c0_15, %c0_16], %27 {strides = array<i32>} : memref<8x128xf32, #tpu.memory_space<vmem>>, vector<8x128xf32>,
    %c0_17 = arith.constant 0 : index
    %c0_18 = arith.constant 0 : index
    %29 = vector.load %arg7[%c0_17, %c0_18] : memref<8x128xf32, #tpu.memory_space<vmem>>, vector<8x128xf32>
    tpu.vector_store %arg7[%c0_17, %c0_18], %25 {strides = array<i32>} : memref<8x128xf32, #tpu.memory_space<vmem>>, vector<8x128xf32>,
    return
  }
  func.func @transform_0(%arg0: i32) -> (i32, i32) {
    %c0_i32 = arith.constant 0 : i32
    %c0_i32_0 = arith.constant 0 : i32
    return %arg0, %c0_i32 : i32, i32
  }
  func.func @transform_1(%arg0: i32) -> (i32, i32) {
    %c0_i32 = arith.constant 0 : i32
    %c0_i32_0 = arith.constant 0 : i32
    %c0_i32_1 = arith.constant 0 : i32
    return %c0_i32, %c0_i32_0 : i32, i32
  }
  func.func @transform_2(%arg0: i32) -> (i32, i32) {
    %c0_i32 = arith.constant 0 : i32
    %c0_i32_0 = arith.constant 0 : i32
    %c0_i32_1 = arith.constant 0 : i32
    return %c0_i32, %c0_i32_0 : i32, i32
  }
  func.func @transform_3(%arg0: i32) -> (i32, i32) {
    %c0_i32 = arith.constant 0 : i32
    %c0_i32_0 = arith.constant 0 : i32
    %c0_i32_1 = arith.constant 0 : i32
    return %c0_i32, %c0_i32_0 : i32, i32
  }
  func.func @transform_4(%arg0: i32) -> (i32, i32) {
    %c0_i32 = arith.constant 0 : i32
    %c0_i32_0 = arith.constant 0 : i32
    %c0_i32_1 = arith.constant 0 : i32
    return %c0_i32, %c0_i32_0 : i32, i32
  }
  func.func @transform_5(%arg0: i32) -> (i32, i32) {
    %c0_i32 = arith.constant 0 : i32
    %c0_i32_0 = arith.constant 0 : i32
    return %arg0, %c0_i32 : i32, i32
  }
  func.func @transform_6(%arg0: i32) -> (i32, i32) {
    %c0_i32 = arith.constant 0 : i32
    %c0_i32_0 = arith.constant 0 : i32
    return %arg0, %c0_i32 : i32, i32
  }
}

</mosaic_0001>

<bundles_post_ra>
// kernel: tpu_custom_call.1
= control target key start
LH: loop header
LB: loop body
LE: loop exit
PB: predicated region body
PF: predicated region fallthrough
CT: control target
= control target key end

     0   :  { %s1576_s0 = inlined_call_operand.hbm [shape: bf16[16,128], index: 0, kind: input, shape index: {}]   ;;  %s1577_s1 = inlined_call_operand.hbm [shape: bf16[128,128], index: 1, kind: input, shape index: {}]   ;;  %s1578_s2 = inlined_call_operand.vmem [shape: f32[1,128], index: 2, kind: input, shape index: {}]   ;;  %s1579_s3 = inlined_call_operand.hbm [shape: bf16[128,128], index: 3, kind: input, shape index: {}]   ;;  %s1580_s4 = inlined_call_operand.hbm [shape: bf16[128,128], index: 4, kind: input, shape index: {}]   ;;  %s1581_s5 = inlined_call_operand.hbm [shape: f32[16,128], index: 5, kind: output, shape index: {0}]   ;;  %s1582_s6 = inlined_call_operand.hbm [shape: f32[16,128], index: 6, kind: output, shape index: {1}]  }
   0x1   :  { %1587 = sst [smem:[#allocation18_spill]] %s1577_s1 }
   0x2   :  { %12 = vsyncpa [#allocation3], 0 }
   0x3   :  { %14 = vsyncpa [#allocation3 + $0x1], 0 }
   0x4   :  { %15 = vsyncpa [#allocation6], 0 }
   0x5   :  { %16 = vsyncpa [#allocation9], 0 }
   0x6   :  { %17 = vsyncpa [#allocation4], 0 }
   0x7   :  { %19 = vsyncpa [#allocation4 + $0x1], 0 }
   0x8   :  { %20 = vsyncpa [#allocation12], 0 }
   0x9   :  { %22 = vsyncpa [#allocation12 + $0x1], 0  ;;  %s1326_s21 = smov 0   ;;  %s1328_s22 = smov 0  }
   0xa   :  { %s1330_s23 = smov 0   ;;  %s1332_s24 = smov 0  }
   0xb LB: > { %s1347_s25 = sadd.s32 4294967295, %s1279_s24   ;;  %s824_s26 = sadd.s32 4294967294, %s1279_s24   ;;  %s1279_s24 = sphi %s1332_s24, %s1608_s24   ;;  %s1275_s23 = sphi %s1330_s23, %s1607_s23   ;;  %s1271_s22 = sphi %s1328_s22, %s1606_s22   ;;  %s1267_s21 = sphi %s1326_s21, %s1605_s21  }
   0xc   : > { %p48_p0 = scmp.ne.s32.totalorder %s1271_s22, %s1267_s21  ;;  %p1583_p1 = scmp.eq.s32.totalorder %s1347_s25, 0 }
   0xd   : > { %p162_p3 = scmp.eq.s32.totalorder %s824_s26, 1  ;;  %p825_p5 = scmp.ge.s32.totalorder %s1279_s24, 1 }
   0xe   : > { %p1356_p4 = por %p1583_p1, %p48_p0  ;;  %p195_p7 = scmp.lt.s32.totalorder %s1279_s24, 3 }
   0xf   : > { %p1361_p6 = por %p162_p3, %p48_p0  ;;  %s1281_s30 = smov [#allocation5]  }
  0x10   : > { %s1588_s27 = scalar_select %p1356_p4, 1, 0 }
  0x11   : > { %s1589_s28 = scalar_select %p1361_p6, 1, 0 }
  0x12   : > { %p1366_p8 = pnand %p825_p5, %p195_p7  ;;  %s207_s7 = sshll.u32 %s1281_s30, 4  ;;  %s208_s7 = int_to_ptr.vmem [resolvable:$true] %s207_s7 }
  0x13   : > { %s1282_s9 = smov [#allocation7]   ;;  %s1283_s11 = smov [#allocation8]  }
  0x14   : > { %s1590_s29 = scalar_select %p1366_p8, 1, 0 }
  0x15   : > { %p975_p9 = pneg %p1366_p8  ;;  %s223_s10 = sshll.u32 %s1282_s9, 4  ;;  %s224_s10 = int_to_ptr.vmem [resolvable:$true] %s223_s10 }
  0x16   : > { %s236_s12 = sshll.u32 %s1283_s11, 4  ;;  %s1082_s13 = scalar_lea.vmem %s208_s7, 1024  ;;  %s237_s12 = int_to_ptr.vmem [resolvable:$true] %s236_s12 }
  0x17   : > { %p1375_p11 = pnand %p975_p9, %p1583_p1  ;;  %p1083_p13 = scmp.ne.s32.totalorder %s208_s7, %s1082_s13 }
  0x18   : > { %p1090_p5 = scmp.lt.s32.totalorder %s208_s7, %s208_s7  ;;  %p1091_p7 = scmp.lt.s32.totalorder %s1082_s13, %s1082_s13 }
  0x19   : > { %p1073_p12 = pneg %p1375_p11 }
  0x1a   : > { %p1092_p9 = por %p1091_p7, %p1090_p5 }
  0x1b   : > { %p1085_p0 = pnand %p1083_p13, %p1073_p12 }
  0x1d   : > { %p1086_p3 = pneg %p1085_p0 }
  0x1f   : > { %p1093_p10 = pnand %p1092_p9, %p1086_p3 }
  0x21   : > { %1096 = shalt.err (!%p1093_p10)
}
  0x22   : > { %s1284_s14 = smov 64   ;;  %s1285_s15 = smov 4  }
  0x23   : > { %s1592_s1 = sld [smem:[#allocation18_spill]]  ;;  %s1108_s18 = scalar_lea.vmem %s224_s10, 1024 }
  0x24   : > { %p1109_p1 = scmp.ne.s32.totalorder %s224_s10, %s1108_s18  ;;  %p1116_p2 = scmp.lt.s32.totalorder %s224_s10, %s224_s10 }
  0x25   : > { %p1117_p6 = scmp.lt.s32.totalorder %s1108_s18, %s1108_s18 }
  0x26   : > { %p1111_p13 = pnand %p1109_p1, %p1073_p12 }
  0x27   : > { %p1118_p5 = por %p1117_p6, %p1116_p2 }
  0x28   : > { %p1112_p0 = pneg %p1111_p13 }
  0x29   : > { %978 = dma.hbm_to_vmem [thread:$0]  (!%p1375_p11), %s1592_s1, 1024, %s208_s7, [#allocation6], %s1284_s14, %s1284_s14, %s1285_s15  }
  0x2a   : > { %p1119_p3 = pnand %p1118_p5, %p1112_p0 }
  0x2c   : > { %1122 = shalt.err (!%p1119_p3)
}
  0x2d   : > { %981 = dma.hbm_to_vmem [thread:$0]  (!%p1375_p11), %s1579_s3, 1024, %s224_s10, [#allocation6], %s1284_s14, %s1284_s14, %s1285_s15  }
  0x2e   : > { %s1134_s26 = scalar_lea.vmem %s237_s12, 1024  ;;  %p1142_p9 = scmp.lt.s32.totalorder %s237_s12, %s237_s12 }
  0x2f   : > { %p1135_p10 = scmp.ne.s32.totalorder %s237_s12, %s1134_s26  ;;  %p1143_p13 = scmp.lt.s32.totalorder %s1134_s26, %s1134_s26 }
  0x31   : > { %p1137_p7 = pnand %p1135_p10, %p1073_p12  ;;  %p1144_p4 = por %p1143_p13, %p1142_p9 }
  0x33   : > { %p1138_p1 = pneg %p1137_p7 }
  0x35   : > { %p1145_p2 = pnand %p1144_p4, %p1138_p1 }
  0x37   : > { %1148 = shalt.err (!%p1145_p2)
}
  0x38   : > { %984 = dma.hbm_to_vmem [thread:$0]  (!%p1375_p11), %s1580_s4, 1024, %s237_s12, [#allocation9], %s1284_s14, %s1284_s14, %s1285_s15  }
  0x39   : > { %s1406_s9 = sadd.s32 1, %s1279_s24   ;;  %s35_s8 = sadd.s32 1, %s1275_s23 }
  0x3a   : > { %s32_s10 = ssub.s32 %s1279_s24, %s1406_s9  ;;  %p42_p6 = scmp.ne.s32.totalorder %s1275_s23, %s1271_s22 }
  0x3b   : > { %p33_p4 = scmp.eq.s32.totalorder %s32_s10, 0  ;;  %p43_p12 = scmp.eq.s32.totalorder %s1279_s24, 0 }
  0x3c   : > { %p999_p0 = scmp.lt.s32.totalorder %s1279_s24, 2  ;;  %p1593_p3 = scmp.eq.s32.totalorder %s1347_s25, 1 }
  0x3d   : > { %s1416_s11 = scalar_select %p33_p4, %s1275_s23, %s35_s8  }
  0x3e   : > { %p44_p5 = por %p43_p12, %p42_p6  ;;  %p1420_p10 = por %p1593_p3, %p42_p6 }
  0x3f   : > { %s250_s16 = sand.u32 1, %s1275_s23   ;;  %s831_s17 = sshll.u32 %s1279_s24, 6 }
  0x40   : > { %s1594_s13 = scalar_select %p1420_p10, 1, 0 }
  0x41   : > { %s830_s12 = sshll.u32 %s250_s16, 2  ;;  %s1429_s18 = scalar_lea.hbm %s1576_s0, %s831_s17 }
  0x42   : > { %s254_s19 = scalar_lea.vmem [#allocation2], %s830_s12  ;;  %p1431_p11 = pnand %p999_p0, %p44_p5 }
  0x43   : > { %s261_s20 = sshll.u32 %s254_s19, 4  ;;  %s251_s30 = scalar_lea.sflag [#allocation3], %s250_s16  ;;  %s262_s20 = int_to_ptr.vmem [resolvable:$true] %s261_s20 }
  0x44   : > { %s1149_s7 = scalar_lea.hbm %s1429_s18, 64  ;;  %p1151_p1 = pneg %p1431_p11 }
  0x45   : > { %p1150_p7 = scmp.ne.s32.totalorder %s1429_s18, %s1149_s7  ;;  %s1154_s17 = scalar_lea.hbm %s1576_s0, 128 }
  0x46   : > { %p1155_p2 = scmp.lt.s32.totalorder %s1429_s18, %s1576_s0  ;;  %p1156_p4 = scmp.lt.s32.totalorder %s1154_s17, %s1149_s7 }
  0x47   : > { %p1152_p9 = pnand %p1151_p1, %p1150_p7 }
  0x48   : > { %p1157_p6 = por %p1156_p4, %p1155_p2 }
  0x49   : > { %p1153_p13 = pneg %p1152_p9 }
  0x4b   : > { %p1158_p12 = pnand %p1157_p6, %p1153_p13 }
  0x4d   : > { %1161 = shalt.err (!%p1158_p12)
}
  0x4e   : > { %s1162_s15 = scalar_lea.vmem %s262_s20, 64  ;;  %s1286_s16 = smov [#allocation2]  }
  0x4f   : > { %p1163_p0 = scmp.ne.s32.totalorder %s262_s20, %s1162_s15  ;;  %s1167_s19 = sshll.u32 %s1286_s16, 4  ;;  %s1168_s19 = int_to_ptr.vmem [resolvable:$false] %s1167_s19 }
  0x50   : > { %s1169_s1 = scalar_lea.vmem %s1168_s19, 128  ;;  %p1170_p7 = scmp.lt.s32.totalorder %s262_s20, %s1168_s19 }
  0x51   : > { %p1165_p5 = pnand %p1163_p0, %p1151_p1  ;;  %p1171_p9 = scmp.lt.s32.totalorder %s1169_s1, %s1162_s15 }
  0x53   : > { %p1166_p3 = pneg %p1165_p5  ;;  %p1172_p10 = por %p1171_p9, %p1170_p7 }
  0x55   : > { %p1173_p8 = pnand %p1172_p10, %p1166_p3 }
  0x57   : > { %1176 = shalt.err (!%p1173_p8)
}
  0x58   : > { %988 = dma.hbm_to_vmem [thread:$0]  (!%p1431_p11), %s1429_s18, 64, %s262_s20, %s251_s30  }
  0x59   : > { %p1596_p13 = scmp.ne.s32.totalorder %s1590_s29, 0 }
  0x5a   : > { %s1452_s7 = sand.u32 (!%p1596_p13), 1, %s1271_s22   ;;  %p1597_p1 = scmp.ne.s32.totalorder (!%p1596_p13), %s1588_s27, 0 }
  0x5b   : > { %270 = sbr.rel (%p1596_p13) target bundleno = 1049 (0x419), region = 40  ;;  %s833_s10 = sshll.u32 (!%p1596_p13), %s1452_s7, 2 }
  0x5c   : > { %s273_s8 = scalar_lea.sflag (!%p1596_p13), [#allocation3], %s1452_s7  ;;  %s1456_s17 = scalar_lea.vmem (!%p1596_p13), [#allocation2], %s833_s10 }
  0x60   : > { %1246 = dma.done.wait (%p1597_p1), %s273_s8, 64  }
  0x61   : > { %1248 = vsyncadd (%p1597_p1), %s273_s8, 4294967232  ;;  %p1598_p8 = scmp.eq.s32.totalorder %s1347_s25, 0 }
  0x63   : > { %1250 = dma.done.wait (%p1598_p8), [#allocation6], 2048   ;;  %p1599_p10 = pmov %p1598_p8 }
  0x64   : > { %p1600_p11 = pmov %p1598_p8 }
  0x65   : > { %1252 = vsyncadd (%p1599_p10), [#allocation6], 4294965248 }
  0x66   : > { %1254 = dma.done.wait (%p1600_p11), [#allocation9], 1024   ;;  %p1601_p2 = pmov %p1598_p8 }
  0x67   : > { %v1287_v0 = vmov 0.0   ;;  %vm1288_vm0 = vmmov 0   ;;  %v1043_v1 = vld [vmem:[#allocation5 + $0x38] sm:$0xff]   ;;  %v1044_v2 = vld [vmem:[#allocation5 + $0x30] sm:$0xff]   ;;  %v1045_v3 = vld [vmem:[#allocation5 + $0x28] sm:$0xff]   ;;  %v540_v25 = vlaneseq  ;;  %s837_s29 = sshll.u32 %s1452_s7, 3 }
  0x68   : > { %1256 = vsyncadd (%p1601_p2), [#allocation9], 4294966272  ;;  %897 = vmatprep.subr.bf16.mxu0 %v1287_v0  ;;  %913 = vmatprep.mubr.msk.bf16.mxu0 %vm1288_vm0, %v1287_v0  ;;  %v1051_v4 = vld [vmem:[#allocation7 + $0x38] sm:$0xff]   ;;  %v1046_v5 = vld [vmem:[#allocation5 + $0x20] sm:$0xff]   ;;  %s321_s18 = scalar_lea.vmem [#allocation11], %s837_s29  ;;  %s866_s20 = sshll.u32 %s1347_s25, 7 }
  0x69   : > { %917 = vmatprep.subr.bf16.mxu1 %v1287_v0  ;;  %933 = vmatprep.mubr.msk.bf16.mxu1 %vm1288_vm0, %v1287_v0  ;;  %v1047_v6 = vld [vmem:[#allocation5 + $0x18] sm:$0xff]   ;;  %v1052_v7 = vld [vmem:[#allocation7 + $0x30] sm:$0xff]   ;;  %v1049_v9 = vld [vmem:[#allocation5 + $0x8] sm:$0xff]   ;;  %v541_v26 = vand.u32 127, %v540_v25  ;;  %s693_s26 = sshll.u32 %s321_s18, 4  ;;  %s691_s12 = scalar_lea.hbm %s1582_s6, %s866_s20  ;;  %s694_s26 = int_to_ptr.vmem [resolvable:$true] %s693_s26 }
  0x6a   : > { %898 = vmatpush3.bf16.msra.mxu0 %v1043_v1  ;;  %918 = vmatpush3.bf16.xpose.msra.mxu1 %v1051_v4  ;;  %v1048_v8 = vld [vmem:[#allocation5 + $0x10] sm:$0xff]   ;;  %v1053_v10 = vld [vmem:[#allocation7 + $0x28] sm:$0xff]   ;;  %v1050_v11 = vld [vmem:[#allocation5] sm:$0xff]   ;;  %s667_s15 = scalar_lea.sflag [#allocation12], %s1452_s7  ;;  %s1177_s16 = scalar_lea.vmem %s694_s26, 128 }
  0x6b   : > { %899 = vmatprep.subr.bf16.mxu0 %v1287_v0  ;;  %919 = vmatprep.subr.bf16.mxu1 %v1287_v0  ;;  %v323_v12 = vld [vmem:[%s1456_s17] sm:$0xf]  ;;  %v1054_v13 = vld [vmem:[#allocation7 + $0x20] sm:$0xff]   ;;  %v1056_v15 = vld [vmem:[#allocation7 + $0x10] sm:$0xff]   ;;  %vm542_vm1 = vcmp.lt.s32.totalorder %v541_v26, 16  ;;  %p1178_p4 = scmp.ne.s32.totalorder %s694_s26, %s1177_s16  ;;  %p1602_p6 = scmp.ne.s32.totalorder %s1594_s13, 0 }
  0x6c   : > { %v1055_v14 = vld [vmem:[#allocation7 + $0x18] sm:$0xff]   ;;  %v1057_v16 = vld [vmem:[#allocation7 + $0x8] sm:$0xff]   ;;  %v1058_v17 = vld [vmem:[#allocation7] sm:$0xff]   ;;  %s1289_s19 = smov [#allocation11]  }
  0x6d   : > { %v839_v18 = vld [vmem:[%s1578_s2] ss:$0 sm:$0xff]  ;;  %v1060_v33 = vld [vmem:[#allocation8 + $0x30] sm:$0xff]   ;;  %v1061_v34 = vld [vmem:[#allocation8 + $0x28] sm:$0xff]   ;;  %p1179_p12 = pnand %p1178_p4, %p1602_p6  ;;  %s1181_s10 = sshll.u32 %s1289_s19, 4  ;;  %s1182_s10 = int_to_ptr.vmem [resolvable:$false] %s1181_s10 }
  0x6e   : > { %900 = vmatpush3.bf16.msra.mxu0 %v1044_v2  ;;  %v1059_v32 = vld [vmem:[#allocation8 + $0x38] sm:$0xff]   ;;  %v1062_v35 = vld [vmem:[#allocation8 + $0x20] sm:$0xff]   ;;  %v1064_v41 = vld [vmem:[#allocation8 + $0x10] sm:$0xff]   ;;  %s1183_s8 = scalar_lea.vmem %s1182_s10, 256  ;;  %p1184_p5 = scmp.lt.s32.totalorder %s694_s26, %s1182_s10 }
  0x6f   : > { %901 = vmatprep.subr.bf16.mxu0 %v1287_v0  ;;  %v1063_v40 = vld [vmem:[#allocation8 + $0x18] sm:$0xff]   ;;  %v1065_v42 = vld [vmem:[#allocation8 + $0x8] sm:$0xff]   ;;  %v1066_v43 = vld [vmem:[#allocation8] sm:$0xff]   ;;  %p1180_p0 = pneg %p1179_p12  ;;  %p1185_p3 = scmp.lt.s32.totalorder %s1183_s8, %s1177_s16 }
  0x71   : > { %p1186_p7 = por %p1185_p3, %p1184_p5 }
  0x72   : > { %902 = vmatpush3.bf16.msra.mxu0 %v1045_v3  ;;  %920 = vmatpush3.bf16.xpose.msra.mxu1 %v1052_v7 }
  0x73   : > { %903 = vmatprep.subr.bf16.mxu0 %v1287_v0  ;;  %921 = vmatprep.subr.bf16.mxu1 %v1287_v0  ;;  %p1187_p9 = pnand %p1186_p7, %p1180_p0 }
  0x76   : > { %904 = vmatpush3.bf16.msra.mxu0 %v1046_v5 }
  0x77   : > { %905 = vmatprep.subr.bf16.mxu0 %v1287_v0 }
  0x7a   : > { %906 = vmatpush3.bf16.msra.mxu0 %v1047_v6  ;;  %922 = vmatpush3.bf16.xpose.msra.mxu1 %v1053_v10 }
  0x7b   : > { %907 = vmatprep.subr.bf16.mxu0 %v1287_v0  ;;  %923 = vmatprep.subr.bf16.mxu1 %v1287_v0 }
  0x7e   : > { %908 = vmatpush3.bf16.msra.mxu0 %v1048_v8 }
  0x7f   : > { %909 = vmatprep.subr.bf16.mxu0 %v1287_v0 }
  0x82   : > { %910 = vmatpush3.bf16.msra.mxu0 %v1049_v9  ;;  %924 = vmatpush3.bf16.xpose.msra.mxu1 %v1054_v13 }
  0x83   : > { %911 = vmatprep.subr.bf16.mxu0 %v1287_v0  ;;  %925 = vmatprep.subr.bf16.mxu1 %v1287_v0 }
  0x86   : > { %912 = vmatpush3.bf16.msra.mxu0 %v1050_v11 }
  0x87   : > { %937 = vmatprep.subr.bf16.mxu0 %v1287_v0 }
  0x89   : > { %914 = vmatmul.mubr.bf16.vlgmr.msra.gmra.mxu0 %v323_v12 }
  0x8a   : > { %953 = vmatprep.mubr.msk.bf16.mxu0 %vm1288_vm0, %v1287_v0  ;;  %926 = vmatpush3.bf16.xpose.msra.mxu1 %v1055_v14 }
  0x8b   : > { %927 = vmatprep.subr.bf16.mxu1 %v1287_v0  ;;  %938 = vmatpush3.bf16.msra.mxu0 %v1059_v32 }
  0x8c   : > { %939 = vmatprep.subr.bf16.mxu0 %v1287_v0 }
  0x8f   : > { %940 = vmatpush3.bf16.msra.mxu0 %v1060_v33 }
  0x90   : > { %941 = vmatprep.subr.bf16.mxu0 %v1287_v0 }
  0x92   : > { %928 = vmatpush3.bf16.xpose.msra.mxu1 %v1056_v15 }
  0x93   : > { %929 = vmatprep.subr.bf16.mxu1 %v1287_v0  ;;  %942 = vmatpush3.bf16.msra.mxu0 %v1061_v34 }
  0x94   : > { %943 = vmatprep.subr.bf16.mxu0 %v1287_v0 }
  0x97   : > { %944 = vmatpush3.bf16.msra.mxu0 %v1062_v35 }
  0x98   : > { %945 = vmatprep.subr.bf16.mxu0 %v1287_v0 }
  0x9a   : > { %930 = vmatpush3.bf16.xpose.msra.mxu1 %v1057_v16 }
  0x9b   : > { %931 = vmatprep.subr.bf16.mxu1 %v1287_v0  ;;  %946 = vmatpush3.bf16.msra.mxu0 %v1063_v40 }
  0x9c   : > { %947 = vmatprep.subr.bf16.mxu0 %v1287_v0 }
  0x9f   : > { %948 = vmatpush3.bf16.msra.mxu0 %v1064_v41 }
  0xa0   : > { %949 = vmatprep.subr.bf16.mxu0 %v1287_v0 }
  0xa2   : > { %932 = vmatpush3.bf16.xpose.msra.mxu1 %v1058_v17 }
  0xa3   : > { %950 = vmatpush3.bf16.msra.mxu0 %v1065_v42 }
  0xa4   : > { %951 = vmatprep.subr.bf16.mxu0 %v1287_v0 }
  0xa7   : > { %952 = vmatpush3.bf16.msra.mxu0 %v1066_v43 }
 0x149   : > { %v429_v19 = vpop.f32.mrf.mxu0 }
 0x14a   : > { %v430_v20 = vadd.f32 %v839_v18, %v429_v19 }
 0x14b   : > { %v915_v21 = vpop.f32.mrf.mxu0 }
 0x14c   : > { %v435_v22 = vpack.c.bf16 %v430_v20, %v430_v20 }
 0x14d   : > { %v432_v23 = vpop.f32.mrf.mxu0 }
 0x14e   : > { %934 = vmatmul.mubr.bf16.vlgmr.msra.gmra.mxu1 %v435_v22 }
 0x14f   : > { %v916_v24 = vpop.f32.mrf.mxu0 }
 0x20e   : > { %v534_v27 = vpop.f32.mrf.mxu1 }
 0x20f   : > { %v543_v28 = vsel %vm542_vm1, %v534_v27, -1e+30 }
 0x210   : > { %544 = vmax.xlane.f32.xlu0 %v543_v28  ;;  %v935_v29 = vpop.f32.mrf.mxu1 }
 0x212   : > { %v537_v30 = vpop.f32.mrf.mxu1 }
 0x214   : > { %v936_v31 = vpop.f32.mrf.mxu1 }
 0x299   : > { %v545_v36 = vpop.xlane.xlu0 %544 }
 0x29a   : > { %v546_v37 = vsub.f32 %v543_v28, %v545_v36 }
 0x29c   : > { %v547_v38 = vmul.f32 1.442695, %v546_v37 }
 0x29e   : > { %1067 = vpow2.f32 %v547_v38 }
 0x2ab   : > { %v1068_v39 = vpop.eup %1067 }
 0x2ac   : > { %549 = vadd.xlane.f32.xlu0 %v1068_v39 }
 0x335   : > { %v550_v44 = vpop.xlane.xlu0 %549 }
 0x336   : > { %1069 = vrcp.f32 %v550_v44 }
 0x343   : > { %v1070_v45 = vpop.eup %1069 }
 0x344   : > { %v569_v46 = vmul.f32 %v1070_v45, %v1068_v39 }
 0x346   : > { %v570_v47 = vpack.c.bf16 %v569_v46, %v569_v46  ;;  %660 = vst [vmem:[%s321_s18] sm:$0xff] %v569_v46 }
 0x348   : > { %954 = vmatmul.mubr.bf16.vlgmr.msra.gmra.mxu0 %v570_v47 }
 0x349   : > { %1190 = shalt.err (!%p1187_p9)
}
 0x34a   : > { %s1191_s17 = scalar_lea.hbm %s691_s12, 128  ;;  %s1195_s18 = scalar_lea.hbm %s1582_s6, 256 }
 0x34b   : > { %p1192_p13 = scmp.ne.s32.totalorder %s691_s12, %s1191_s17  ;;  %p1196_p10 = scmp.lt.s32.totalorder %s691_s12, %s1582_s6 }
 0x34c   : > { %p1197_p11 = scmp.lt.s32.totalorder %s1195_s18, %s1191_s17 }
 0x34d   : > { %p1193_p1 = pnand %p1192_p13, %p1602_p6 }
 0x34e   : > { %p1198_p2 = por %p1197_p11, %p1196_p10 }
 0x34f   : > { %p1194_p8 = pneg %p1193_p1 }
 0x351   : > { %p1199_p4 = pnand %p1198_p2, %p1194_p8 }
 0x353   : > { %1202 = shalt.err (!%p1199_p4)
}
 0x354   : > { %972 = dma.vmem_to_hbm [thread:$0]  (%p1602_p6), %s694_s26, 128, %s691_s12, %s667_s15  }
 0x355   : > { %s314_s16 = scalar_lea.vmem [#allocation10], %s837_s29  ;;  %s1535_s17 = scalar_lea.hbm %s1581_s5, %s866_s20 }
 0x356   : > { %s680_s19 = sshll.u32 %s314_s16, 4  ;;  %s662_s1 = scalar_lea.sflag [#allocation4], %s1452_s7  ;;  %s1528_s19 = int_to_ptr.vmem [resolvable:$true] %s680_s19 }
 0x357   : > { %s1203_s27 = scalar_lea.vmem %s1528_s19, 128  ;;  %s1290_s29 = smov [#allocation10]  }
 0x358   : > { %p1204_p12 = scmp.ne.s32.totalorder %s1528_s19, %s1203_s27  ;;  %s1207_s26 = sshll.u32 %s1290_s29, 4  ;;  %s1208_s26 = int_to_ptr.vmem [resolvable:$false] %s1207_s26 }
 0x359   : > { %s1209_s25 = scalar_lea.vmem %s1208_s26, 256  ;;  %p1210_p3 = scmp.lt.s32.totalorder %s1528_s19, %s1208_s26 }
 0x35a   : > { %p1205_p0 = pnand %p1204_p12, %p1602_p6  ;;  %p1211_p7 = scmp.lt.s32.totalorder %s1209_s25, %s1203_s27 }
 0x35c   : > { %p1206_p5 = pneg %p1205_p0  ;;  %p1212_p9 = por %p1211_p7, %p1210_p3 }
 0x35e   : > { %p1213_p13 = pnand %p1212_p9, %p1206_p5 }
 0x408   : > { %v653_v48 = vpop.f32.mrf.mxu0 }
 0x409   : > { %659 = vst [vmem:[%s314_s16] sm:$0xff] %v653_v48 }
 0x40a   : > { %v955_v49 = vpop.f32.mrf.mxu0 }
 0x40b   : > { %1216 = shalt.err (!%p1213_p13)
}
 0x40c   : > { %s1217_s20 = scalar_lea.hbm %s1535_s17, 128  ;;  %s1221_s15 = scalar_lea.hbm %s1581_s5, 256 }
 0x40d   : > { %p1218_p1 = scmp.ne.s32.totalorder %s1535_s17, %s1217_s20  ;;  %p1222_p11 = scmp.lt.s32.totalorder %s1535_s17, %s1581_s5 }
 0x40e   : > { %p1223_p2 = scmp.lt.s32.totalorder %s1221_s15, %s1217_s20 }
 0x40f   : > { %p1219_p8 = pnand %p1218_p1, %p1602_p6 }
 0x410   : > { %p1224_p4 = por %p1223_p2, %p1222_p11 }
 0x411   : > { %p1220_p10 = pneg %p1219_p8 }
 0x413   : > { %p1225_p12 = pnand %p1224_p4, %p1220_p10 }
 0x415   : > { %1228 = shalt.err (!%p1225_p12)
}
 0x416   : > { %971 = dma.vmem_to_hbm [thread:$0]  (%p1602_p6), %s1528_s19, 128, %s1535_s17, %s662_s1   ;;  %v656_v50 = vpop.f32.mrf.mxu0 }
 0x418   : > { %v956_v51 = vpop.f32.mrf.mxu0 }
 0x419 PF: > { %s705_s14 = sand.u32 1, %s1267_s21   ;;  %p1603_p0 = scmp.ne.s32.totalorder %s1589_s28, 0 }
 0x41a   : > { %p1604_p5 = scmp.ge.s32.totalorder %s1279_s24, 2  ;;  %s706_s16 = scalar_lea.sflag [#allocation4], %s705_s14 }
 0x41c   : > { %p990_p3 = pnand %p1604_p5, %p1603_p0 }
 0x41e   : > { %p991_p7 = pneg %p990_p3 }
 0x420   : > { %1258 = dma.done.wait (%p991_p7), %s706_s16, 128  }
 0x421   : > { %1260 = vsyncadd (%p991_p7), %s706_s16, 4294967168  ;;  %s715_s10 = scalar_lea.sflag [#allocation12], %s705_s14 }
 0x422   : > { %1262 = dma.done.wait (%p991_p7), %s715_s10, 128  }
 0x423   : > { %1264 = vsyncadd (%p991_p7), %s715_s10, 4294967168  ;;  %p25_p6 = scmp.ge.s32.totalorder %s1406_s9, 4   ;;  %s1605_s21 = smov %s1271_s22 }
 0x424   : > { %s1606_s22 = smov %s1275_s23  ;;  %s1607_s23 = smov %s1416_s11 }
 0x425   : > { %s1608_s24 = smov %s1406_s9  ;;  %27 = sbr.rel (!%p25_p6) target bundleno = 11 (0xb), region = 114 }
 0x42a   :  { %720 = vsyncpa [#allocation3], 1 }
 0x42b   :  { %722 = vsyncpa [#allocation3 + $0x1], 1 }
 0x42c   :  { %723 = vsyncpa [#allocation6], 1 }
 0x42d   :  { %724 = vsyncpa [#allocation9], 1 }
 0x42e   :  { %725 = vsyncpa [#allocation4], 1 }
 0x42f   :  { %727 = vsyncpa [#allocation4 + $0x1], 1 }
 0x430   :  { %728 = vsyncpa [#allocation12], 1 }
 0x431   :  { %730 = vsyncpa [#allocation12 + $0x1], 1 }

</bundles_post_ra>
